<compile_context>
chip_gen: v5e
topology: v5e:2x2
jax: 0.10.0
libtpu: 0.0.40
codegen_flags: <defaults>
</compile_context>

<pallas_src>
import functools
from typing import NamedTuple

import jax
import jax.numpy as jnp
from jax.experimental import pallas as pl
from jax.experimental.pallas import tpu as pltpu


def _round_up(v, m):
    return ((v + m - 1) // m) * m


# Squeezed-block-dim sentinel: pl.Squeezed() on newer jax, `None` (classic spelling) otherwise.
try:
    _SQUEEZED = pl.Squeezed()
except AttributeError:  # pragma: no cover
    _SQUEEZED = None


def _vmem_budget_bytes():
    """Generation-aware VMEM budget (~75% of physical: 48 MiB v7x, 96 MiB v5e/v6e)."""
    cap = 64 * 1024 * 1024  # conservative default (v7x has 64 MiB per TensorCore)
    try:
        cap = int(pltpu.get_tpu_info().vmem_capacity_bytes)
    except Exception:
        pass
    return cap * 3 // 4


def _is_dual_core():
    """True on parts with 2 TensorCores per chip (v7x) -> prefer >=2 batch tiles."""
    try:
        kind = jax.devices()[0].device_kind.lower()
        return ("v7" in kind) or ("7x" in kind)
    except Exception:
        return False


class ResMLPMeta(NamedTuple):
    feat_dim: int
    hidden_dim: int
    output_dim: int
    num_layers: int
    kp: int      # feat_dim padded to 128
    hp: int      # hidden_dim padded to 128
    op: int      # output_dim padded to 128
    num_hidden: int  # num_layers - 2


# ---------------------------------------------------------------------------
# One-time parameter preprocessing (call once, NOT per forward):
# pad feature dims to lane multiples of 128, stack hidden layers, cast weights
# to bf16 (biases stay f32).  Weights are [in, out] (transpose of nn.Linear.weight).
# ---------------------------------------------------------------------------
def prepare_params(weights, biases):
    L = len(weights)
    assert L >= 2, "ResMLP must have at least two layers"
    K = weights[0].shape[0]
    H = weights[0].shape[1]
    O = weights[-1].shape[1]
    Lh = L - 2

    Kp = _round_up(K, 128)
    Hp = _round_up(H, 128)
    Op = _round_up(O, 128)

    def pad2(a, r, c):
        return jnp.pad(a, ((0, r - a.shape[0]), (0, c - a.shape[1])))

    w0 = pad2(weights[0], Kp, Hp).astype(jnp.bfloat16)
    b0 = pad2(biases[0], 1, Hp).astype(jnp.float32)
    wl = pad2(weights[-1], Hp, Op).astype(jnp.bfloat16)
    bl = pad2(biases[-1], 1, Op).astype(jnp.float32)
    if Lh > 0:
        wh = jnp.stack([pad2(w, Hp, Hp) for w in weights[1:-1]]).astype(jnp.bfloat16)
        bh = jnp.stack([pad2(b, 1, Hp) for b in biases[1:-1]]).astype(jnp.float32)
    else:  # no hidden layers: dummy block, never read by the compute path
        wh = jnp.zeros((1, Hp, Hp), jnp.bfloat16)
        bh = jnp.zeros((1, 1, Hp), jnp.float32)

    arrays = tuple(jax.device_put(a) for a in (w0, b0, wh, bh, wl, bl))
    arrays = tuple(jax.block_until_ready(a) for a in arrays)
    meta = ResMLPMeta(K, H, O, L, Kp, Hp, Op, Lh)
    return arrays, meta


# ---------------------------------------------------------------------------
# RESIDENT kernel: whole (bf16) weight stack lives in VMEM; grid = (batch_tiles,).
# Hidden layers are statically unrolled (num_hidden is a trace-time constant).
# ---------------------------------------------------------------------------
def _resmlp_resident_kernel(x_ref, w0_ref, b0_ref, wh_ref, bh_ref, wl_ref, bl_ref,
                            out_ref, *, num_hidden):
    # layer 0: feature = relu(x @ W0 + b0); residual = feature
    feature = jnp.maximum(
        jnp.dot(x_ref[...].astype(jnp.bfloat16), w0_ref[...],
                preferred_element_type=jnp.float32) + b0_ref[...], 0.0)
    residual = feature
    # hidden residual blocks
    for i in range(num_hidden):
        f_ = jnp.maximum(
            jnp.dot(feature.astype(jnp.bfloat16), wh_ref[i],
                    preferred_element_type=jnp.float32) + bh_ref[i], 0.0)
        feature = f_ + residual
        residual = f_
    # output layer (no activation)
    out_ref[...] = (jnp.dot(feature.astype(jnp.bfloat16), wl_ref[...],
                            preferred_element_type=jnp.float32) + bl_ref[...])


# ---------------------------------------------------------------------------
# STREAMED kernel: grid = (batch_tiles, num_layers); one layer per grid step,
# hidden weights streamed per layer, activations persist in VMEM scratch.
# ---------------------------------------------------------------------------
def _resmlp_streamed_kernel(x_ref, w0_ref, b0_ref, wh_ref, bh_ref, wl_ref, bl_ref,
                            out_ref, feat_ref, res_ref):
    l = pl.program_id(1)
    num_l = pl.num_programs(1)

    @pl.when(l == 0)
    def _first_layer():
        y = jnp.dot(x_ref[...].astype(jnp.bfloat16), w0_ref[...],
                    preferred_element_type=jnp.float32)
        h = jnp.maximum(y + b0_ref[...], 0.0)
        feat_ref[...] = h
        res_ref[...] = h

    @pl.when(jnp.logical_and(l > 0, l < num_l - 1))
    def _hidden_layer():
        y = jnp.dot(feat_ref[...].astype(jnp.bfloat16), wh_ref[...],
                    preferred_element_type=jnp.float32)
        f_ = jnp.maximum(y + bh_ref[...], 0.0)
        feat_ref[...] = f_ + res_ref[...]
        res_ref[...] = f_

    @pl.when(l == num_l - 1)
    def _last_layer():
        y = jnp.dot(feat_ref[...].astype(jnp.bfloat16), wl_ref[...],
                    preferred_element_type=jnp.float32)
        out_ref[...] = y + bl_ref[...]


# ---------------------------------------------------------------------------
# Jitted impls (meta / tm / vmem_limit are static).
# ---------------------------------------------------------------------------
@functools.partial(jax.jit, static_argnames=("meta", "tm", "vmem_limit"))
def _forward_resident(x, w0, b0, wh, bh, wl, bl, *, meta, tm, vmem_limit):
    M = x.shape[0]
    Kp, Hp, Op, Lh = meta.kp, meta.hp, meta.op, meta.num_hidden
    Lh_ = max(Lh, 1)
    Mp = _round_up(M, tm)
    xp = jnp.pad(x, ((0, Mp - M), (0, Kp - x.shape[1])))

    cost = pl.CostEstimate(
        flops=2 * Mp * (Kp * Hp + Lh * Hp * Hp + Hp * Op),
        transcendentals=0,
        bytes_accessed=(4 * Mp * Kp + 4 * Mp * Op                       # x in, out
                        + 2 * (Kp * Hp + Lh_ * Hp * Hp + Hp * Op)       # bf16 weights, fetched once
                        + 4 * (Hp + Lh_ * Hp + Op)),                    # f32 biases
    )

    kernel = functools.partial(_resmlp_resident_kernel, num_hidden=Lh)

    out = pl.pallas_call(
        kernel,
        out_shape=jax.ShapeDtypeStruct((Mp, Op), jnp.float32),
        grid_spec=pltpu.PrefetchScalarGridSpec(
            num_scalar_prefetch=0,
            grid=(Mp // tm,),
            in_specs=[
                pl.BlockSpec((tm, Kp), lambda b: (b, 0)),            # x (per batch tile)
                pl.BlockSpec((Kp, Hp), lambda b: (0, 0)),            # W0   (resident)
                pl.BlockSpec((1, Hp), lambda b: (0, 0)),             # b0
                pl.BlockSpec((Lh_, Hp, Hp), lambda b: (0, 0, 0)),    # all hidden W (resident)
                pl.BlockSpec((Lh_, 1, Hp), lambda b: (0, 0, 0)),     # all hidden b
                pl.BlockSpec((Hp, Op), lambda b: (0, 0)),            # W_last
                pl.BlockSpec((1, Op), lambda b: (0, 0)),             # b_last
            ],
            out_specs=pl.BlockSpec((tm, Op), lambda b: (b, 0)),
        ),
        compiler_params=pltpu.CompilerParams(
            dimension_semantics=("parallel",),
            vmem_limit_bytes=vmem_limit,
        ),
        cost_estimate=cost,
    )(xp, w0, b0, wh, bh, wl, bl)
    return out[:M, :meta.output_dim]


@functools.partial(jax.jit, static_argnames=("meta", "tm", "vmem_limit"))
def _forward_streamed(x, w0, b0, wh, bh, wl, bl, *, meta, tm, vmem_limit):
    M = x.shape[0]
    Kp, Hp, Op, L, Lh = meta.kp, meta.hp, meta.op, meta.num_layers, meta.num_hidden
    Lh_ = max(Lh, 1)
    Mp = _round_up(M, tm)
    n_tiles = Mp // tm
    xp = jnp.pad(x, ((0, Mp - M), (0, Kp - x.shape[1])))

    def wh_map(b, l):  # clamp so the first/last grid steps index a valid (unused) block
        return (jnp.clip(l - 1, 0, Lh_ - 1), 0, 0)

    cost = pl.CostEstimate(
        flops=2 * Mp * (Kp * Hp + Lh * Hp * Hp + Hp * Op),
        transcendentals=0,
        # hidden weights are re-streamed once per batch tile on this path
        bytes_accessed=(4 * Mp * Kp + 4 * Mp * Op
                        + 2 * (Kp * Hp + Hp * Op + n_tiles * Lh_ * Hp * Hp)
                        + 4 * (Hp + Lh_ * Hp + Op)),
    )

    out = pl.pallas_call(
        _resmlp_streamed_kernel,
        out_shape=jax.ShapeDtypeStruct((Mp, Op), jnp.float32),
        grid_spec=pltpu.PrefetchScalarGridSpec(
            num_scalar_prefetch=0,
            grid=(n_tiles, L),
            in_specs=[
                pl.BlockSpec((tm, Kp), lambda b, l: (b, 0)),      # x (per batch tile)
                pl.BlockSpec((Kp, Hp), lambda b, l: (0, 0)),      # W0   (resident)
                pl.BlockSpec((1, Hp), lambda b, l: (0, 0)),       # b0
                pl.BlockSpec((_SQUEEZED, Hp, Hp), wh_map),        # hidden W streamed per layer
                pl.BlockSpec((_SQUEEZED, 1, Hp), wh_map),         # hidden b streamed per layer
                pl.BlockSpec((Hp, Op), lambda b, l: (0, 0)),      # W_last (resident)
                pl.BlockSpec((1, Op), lambda b, l: (0, 0)),       # b_last
            ],
            out_specs=pl.BlockSpec((tm, Op), lambda b, l: (b, 0)),
            scratch_shapes=[
                pltpu.VMEM((tm, Hp), jnp.float32),   # feature (persists across layer axis)
                pltpu.VMEM((tm, Hp), jnp.float32),   # residual
            ],
        ),
        compiler_params=pltpu.CompilerParams(
            dimension_semantics=("parallel", "arbitrary"),
            vmem_limit_bytes=vmem_limit,
        ),
        cost_estimate=cost,
    )(xp, w0, b0, wh, bh, wl, bl)
    return out[:M, :meta.output_dim]


# ---------------------------------------------------------------------------
# Dispatcher: pick path + batch tile from the VMEM budget (all Python ints).
# ---------------------------------------------------------------------------
def res_mlp_forward(x, arrays, meta, path="auto"):
    Kp, Hp, Op, Lh = meta.kp, meta.hp, meta.op, meta.num_hidden
    Lh_ = max(Lh, 1)
    M = x.shape[0]

    budget = _vmem_budget_bytes()

    # bf16 weight stacks (x2 = conservative allowance for pipeline double-buffering)
    resident_w = 2 * 2 * (Kp * Hp + Lh_ * Hp * Hp + Hp * Op) + 2 * 4 * (Hp + Lh_ * Hp + Op)
    streamed_w = 2 * 2 * (Kp * Hp + Hp * Op + 2 * Hp * Hp) + 2 * 4 * (Hp + Lh_ * Hp + Op)

    if path == "auto":
        resident = resident_w <= budget // 2
    else:
        resident = (path == "resident")
    w_bytes = resident_w if resident else streamed_w

    # Per-row activation VMEM (f32): double-buffered x & out tiles + live feature/residual.
    per_row = 4 * (2 * Kp + 2 * Op + (3 if resident else 2) * Hp)

    Mp8 = _round_up(M, 8)
    tm_cap = max(8, ((budget - w_bytes) // per_row) // 8 * 8)
    tm = max(8, min(1024, tm_cap, Mp8))
    if Mp8 > tm:
        # Same tile count, but evenly sized tiles -> less batch-padding waste.
        n_tiles = -(-Mp8 // tm)
        tm = _round_up(-(-Mp8 // n_tiles), 8)
    elif _is_dual_core() and Mp8 >= 512:
        # v7x: split so both TensorCores get a batch tile.
        tm = _round_up(-(-Mp8 // 2), 8)

    vmem_limit = int(budget)
    if resident:
        return _forward_resident(x, *arrays, meta=meta, tm=int(tm), vmem_limit=vmem_limit)
    return _forward_streamed(x, *arrays, meta=meta, tm=int(tm), vmem_limit=vmem_limit)


# ---------------------------------------------------------------------------
# Pure-JAX f32 reference mirroring the PyTorch forward (eval mode, bn=False).
# ---------------------------------------------------------------------------
def res_mlp_reference(x, weights, biases):
    feature = jnp.maximum(x @ weights[0] + biases[0][0], 0.0)
    residual = feature
    for i in range(1, len(weights) - 1):
        f_ = jnp.maximum(feature @ weights[i] + biases[i][0], 0.0)
        feature = f_ + residual
        residual = f_
    return feature @ weights[-1] + biases[-1][0]


# ---------------------------------------------------------------------------
# Deterministic parameter init (PyTorch nn.Linear default: U(-1/sqrt(in), +)).
# ---------------------------------------------------------------------------
def init_params(key, feat_dim, hidden_dim, num_layers, output_dim):
    dims = [(feat_dim, hidden_dim)]
    dims += [(hidden_dim, hidden_dim)] * (num_layers - 2)
    dims += [(hidden_dim, output_dim)]
    weights, biases = [], []
    for (fan_in, fan_out) in dims:
        key, kw, kb = jax.random.split(key, 3)
        bound = 1.0 / (fan_in ** 0.5)
        # Stored as [in, out] (transpose of PyTorch's [out, in]).
        w = jax.random.uniform(kw, (fan_in, fan_out), jnp.float32, -bound, bound)
        b = jax.random.uniform(kb, (1, fan_out), jnp.float32, -bound, bound)
        weights.append(w)
        biases.append(b)
    return weights, biases


if __name__ == "__main__":
    batch = 8
    feat_dim = 16
    hidden_dim = 32
    output_dim = 8
    num_layers = 4  # >= 2; 4 -> two residual hidden blocks

    key = jax.random.PRNGKey(0)
    key, kx = jax.random.split(key)
    x = jax.random.normal(kx, (batch, feat_dim), jnp.float32)

    weights, biases = init_params(key, feat_dim, hidden_dim, num_layers, output_dim)
    arrays, meta = prepare_params(weights, biases)   # one-time: pad / stack / bf16-cast

    ref = res_mlp_reference(x, weights, biases)

    # Preferred path (weight-resident, single grid axis over batch tiles).
    out_res = jax.block_until_ready(res_mlp_forward(x, arrays, meta, path="auto"))
    assert out_res.shape == (batch, output_dim)
    # bf16 MXU inputs with f32 accumulation -> relaxed tolerance vs f32 reference.
    assert jnp.allclose(out_res, ref, atol=5e-2, rtol=5e-2), "resident path mismatch"

    # Fallback path (per-layer weight streaming) also exercised for coverage.
    out_str = jax.block_until_ready(res_mlp_forward(x, arrays, meta, path="streamed"))
    assert out_str.shape == (batch, output_dim)
    assert jnp.allclose(out_str, ref, atol=5e-2, rtol=5e-2), "streamed path mismatch"

    print("KERNEL_OK")
</pallas_src>

<mosaic_0001>
module attributes {stable_mosaic.version = 11 : i64} {
  func.func @_resmlp_resident_kernel(%arg0: i32, %arg1: memref<8x128xf32, #tpu.memory_space<vmem>>, %arg2: memref<128x128xbf16, #tpu.memory_space<vmem>>, %arg3: memref<1x128xf32, #tpu.memory_space<vmem>>, %arg4: memref<2x128x128xbf16, #tpu.memory_space<vmem>>, %arg5: memref<2x1x128xf32, #tpu.memory_space<vmem>>, %arg6: memref<128x128xbf16, #tpu.memory_space<vmem>>, %arg7: memref<1x128xf32, #tpu.memory_space<vmem>>, %arg8: memref<8x128xf32, #tpu.memory_space<vmem>>) attributes {dimension_semantics = [#tpu.dimension_semantics<parallel>], iteration_bounds = array<i64: 1>, scalar_prefetch = 0 : i64, scratch_operands = 0 : i64, tpu.core_type = #tpu.core_type<tc>, window_params = [{transform_indices = @transform_0, window_bounds = array<i64: 8, 128>}, {pipeline_mode = #tpu.pipeline_mode<synchronous>, transform_indices = @transform_1, window_bounds = array<i64: 128, 128>}, {pipeline_mode = #tpu.pipeline_mode<synchronous>, transform_indices = @transform_2, window_bounds = array<i64: 1, 128>}, {pipeline_mode = #tpu.pipeline_mode<synchronous>, transform_indices = @transform_3, window_bounds = array<i64: 2, 128, 128>}, {pipeline_mode = #tpu.pipeline_mode<synchronous>, transform_indices = @transform_4, window_bounds = array<i64: 2, 1, 128>}, {pipeline_mode = #tpu.pipeline_mode<synchronous>, transform_indices = @transform_5, window_bounds = array<i64: 128, 128>}, {pipeline_mode = #tpu.pipeline_mode<synchronous>, transform_indices = @transform_6, window_bounds = array<i64: 1, 128>}, {transform_indices = @transform_7, window_bounds = array<i64: 8, 128>}]} {
    %c0 = arith.constant 0 : index
    %c0_0 = arith.constant 0 : index
    %0 = vector.load %arg1[%c0, %c0_0] : memref<8x128xf32, #tpu.memory_space<vmem>>, vector<8x128xf32>
    %1 = arith.truncf %0 : vector<8x128xf32> to vector<8x128xbf16>
    %c0_1 = arith.constant 0 : index
    %c0_2 = arith.constant 0 : index
    %2 = vector.load %arg2[%c0_1, %c0_2] : memref<128x128xbf16, #tpu.memory_space<vmem>>, vector<128x128xbf16>
    %cst = arith.constant dense<0.000000e+00> : vector<8x128xf32>
    %3 = tpu.matmul %1, %2, %cst {dimension_numbers = #tpu.dot_dimension_numbers<[1], [0], [0], [1], [0, 0, 1, 1], [], []>} : vector<8x128xbf16>, vector<128x128xbf16>, vector<8x128xf32> -> vector<8x128xf32>
    %c0_3 = arith.constant 0 : index
    %c0_4 = arith.constant 0 : index
    %4 = vector.load %arg3[%c0_3, %c0_4] : memref<1x128xf32, #tpu.memory_space<vmem>>, vector<1x128xf32>
    %5 = vector.broadcast %4 : vector<1x128xf32> to vector<8x128xf32>
    %6 = arith.addf %3, %5 : vector<8x128xf32>
    %cst_5 = arith.constant 0.000000e+00 : f32
    %7 = vector.broadcast %cst_5 : f32 to vector<8x128xf32>
    %8 = arith.maximumf %6, %7 : vector<8x128xf32>
    %9 = arith.truncf %8 : vector<8x128xf32> to vector<8x128xbf16>
    %c0_6 = arith.constant 0 : index
    %c0_7 = arith.constant 0 : index
    %c0_8 = arith.constant 0 : index
    %10 = vector.load %arg4[%c0_6, %c0_7, %c0_8] : memref<2x128x128xbf16, #tpu.memory_space<vmem>>, vector<1x128x128xbf16>
    %11 = vector.shape_cast %10 : vector<1x128x128xbf16> to vector<128x128xbf16>
    %cst_9 = arith.constant dense<0.000000e+00> : vector<8x128xf32>
    %12 = tpu.matmul %9, %11, %cst_9 {dimension_numbers = #tpu.dot_dimension_numbers<[1], [0], [0], [1], [0, 0, 1, 1], [], []>} : vector<8x128xbf16>, vector<128x128xbf16>, vector<8x128xf32> -> vector<8x128xf32>
    %c0_10 = arith.constant 0 : index
    %c0_11 = arith.constant 0 : index
    %c0_12 = arith.constant 0 : index
    %13 = vector.load %arg5[%c0_10, %c0_11, %c0_12] : memref<2x1x128xf32, #tpu.memory_space<vmem>>, vector<1x1x128xf32>
    %14 = vector.shape_cast %13 : vector<1x1x128xf32> to vector<1x128xf32>
    %15 = vector.broadcast %14 : vector<1x128xf32> to vector<8x128xf32>
    %16 = arith.addf %12, %15 : vector<8x128xf32>
    %cst_13 = arith.constant 0.000000e+00 : f32
    %17 = vector.broadcast %cst_13 : f32 to vector<8x128xf32>
    %18 = arith.maximumf %16, %17 : vector<8x128xf32>
    %19 = arith.addf %18, %8 : vector<8x128xf32>
    %20 = arith.truncf %19 : vector<8x128xf32> to vector<8x128xbf16>
    %c1 = arith.constant 1 : index
    %c0_14 = arith.constant 0 : index
    %c0_15 = arith.constant 0 : index
    %21 = vector.load %arg4[%c1, %c0_14, %c0_15] : memref<2x128x128xbf16, #tpu.memory_space<vmem>>, vector<1x128x128xbf16>
    %22 = vector.shape_cast %21 : vector<1x128x128xbf16> to vector<128x128xbf16>
    %cst_16 = arith.constant dense<0.000000e+00> : vector<8x128xf32>
    %23 = tpu.matmul %20, %22, %cst_16 {dimension_numbers = #tpu.dot_dimension_numbers<[1], [0], [0], [1], [0, 0, 1, 1], [], []>} : vector<8x128xbf16>, vector<128x128xbf16>, vector<8x128xf32> -> vector<8x128xf32>
    %c1_17 = arith.constant 1 : index
    %c0_18 = arith.constant 0 : index
    %c0_19 = arith.constant 0 : index
    %24 = vector.load %arg5[%c1_17, %c0_18, %c0_19] : memref<2x1x128xf32, #tpu.memory_space<vmem>>, vector<1x1x128xf32>
    %25 = vector.shape_cast %24 : vector<1x1x128xf32> to vector<1x128xf32>
    %26 = vector.broadcast %25 : vector<1x128xf32> to vector<8x128xf32>
    %27 = arith.addf %23, %26 : vector<8x128xf32>
    %cst_20 = arith.constant 0.000000e+00 : f32
    %28 = vector.broadcast %cst_20 : f32 to vector<8x128xf32>
    %29 = arith.maximumf %27, %28 : vector<8x128xf32>
    %30 = arith.addf %29, %18 : vector<8x128xf32>
    %31 = arith.truncf %30 : vector<8x128xf32> to vector<8x128xbf16>
    %c0_21 = arith.constant 0 : index
    %c0_22 = arith.constant 0 : index
    %32 = vector.load %arg6[%c0_21, %c0_22] : memref<128x128xbf16, #tpu.memory_space<vmem>>, vector<128x128xbf16>
    %cst_23 = arith.constant dense<0.000000e+00> : vector<8x128xf32>
    %33 = tpu.matmul %31, %32, %cst_23 {dimension_numbers = #tpu.dot_dimension_numbers<[1], [0], [0], [1], [0, 0, 1, 1], [], []>} : vector<8x128xbf16>, vector<128x128xbf16>, vector<8x128xf32> -> vector<8x128xf32>
    %c0_24 = arith.constant 0 : index
    %c0_25 = arith.constant 0 : index
    %34 = vector.load %arg7[%c0_24, %c0_25] : memref<1x128xf32, #tpu.memory_space<vmem>>, vector<1x128xf32>
    %35 = vector.broadcast %34 : vector<1x128xf32> to vector<8x128xf32>
    %36 = arith.addf %33, %35 : vector<8x128xf32>
    %c0_26 = arith.constant 0 : index
    %c0_27 = arith.constant 0 : index
    %37 = vector.load %arg8[%c0_26, %c0_27] : memref<8x128xf32, #tpu.memory_space<vmem>>, vector<8x128xf32>
    tpu.vector_store %arg8[%c0_26, %c0_27], %36 {strides = array<i32>} : memref<8x128xf32, #tpu.memory_space<vmem>>, vector<8x128xf32>,
    return
  }
  func.func @transform_0(%arg0: i32) -> (i32, i32) {
    %c0_i32 = arith.constant 0 : i32
    %c0_i32_0 = arith.constant 0 : i32
    return %arg0, %c0_i32 : i32, i32
  }
  func.func @transform_1(%arg0: i32) -> (i32, i32) {
    %c0_i32 = arith.constant 0 : i32
    %c0_i32_0 = arith.constant 0 : i32
    %c0_i32_1 = arith.constant 0 : i32
    return %c0_i32, %c0_i32_0 : i32, i32
  }
  func.func @transform_2(%arg0: i32) -> (i32, i32) {
    %c0_i32 = arith.constant 0 : i32
    %c0_i32_0 = arith.constant 0 : i32
    %c0_i32_1 = arith.constant 0 : i32
    return %c0_i32, %c0_i32_0 : i32, i32
  }
  func.func @transform_3(%arg0: i32) -> (i32, i32, i32) {
    %c0_i32 = arith.constant 0 : i32
    %c0_i32_0 = arith.constant 0 : i32
    %c0_i32_1 = arith.constant 0 : i32
    %c0_i32_2 = arith.constant 0 : i32
    return %c0_i32, %c0_i32_0, %c0_i32_1 : i32, i32, i32
  }
  func.func @transform_4(%arg0: i32) -> (i32, i32, i32) {
    %c0_i32 = arith.constant 0 : i32
    %c0_i32_0 = arith.constant 0 : i32
    %c0_i32_1 = arith.constant 0 : i32
    %c0_i32_2 = arith.constant 0 : i32
    return %c0_i32, %c0_i32_0, %c0_i32_1 : i32, i32, i32
  }
  func.func @transform_5(%arg0: i32) -> (i32, i32) {
    %c0_i32 = arith.constant 0 : i32
    %c0_i32_0 = arith.constant 0 : i32
    %c0_i32_1 = arith.constant 0 : i32
    return %c0_i32, %c0_i32_0 : i32, i32
  }
  func.func @transform_6(%arg0: i32) -> (i32, i32) {
    %c0_i32 = arith.constant 0 : i32
    %c0_i32_0 = arith.constant 0 : i32
    %c0_i32_1 = arith.constant 0 : i32
    return %c0_i32, %c0_i32_0 : i32, i32
  }
  func.func @transform_7(%arg0: i32) -> (i32, i32) {
    %c0_i32 = arith.constant 0 : i32
    %c0_i32_0 = arith.constant 0 : i32
    return %arg0, %c0_i32 : i32, i32
  }
}

</mosaic_0001>

<bundles_post_ra>
// kernel: _forward_resident.1
= control target key start
LH: loop header
LB: loop body
LE: loop exit
PB: predicated region body
PF: predicated region fallthrough
CT: control target
= control target key end

     0   :  { %12 = vsyncpa [#allocation3], 0  ;;  %s775_s0 = inlined_call_operand.vmem [shape: f32[8,128], index: 0, kind: input, shape index: {}]   ;;  %s776_s1 = inlined_call_operand.hbm [shape: bf16[128,128], index: 1, kind: input, shape index: {}]   ;;  %s777_s2 = inlined_call_operand.vmem [shape: f32[1,128], index: 2, kind: input, shape index: {}]   ;;  %s778_s3 = inlined_call_operand.hbm [shape: bf16[2,128,128], index: 3, kind: input, shape index: {}]   ;;  %s779_s4 = inlined_call_operand.vmem [shape: f32[2,1,128], index: 4, kind: input, shape index: {}]   ;;  %s780_s5 = inlined_call_operand.hbm [shape: bf16[128,128], index: 5, kind: input, shape index: {}]   ;;  %s781_s6 = inlined_call_operand.vmem [shape: f32[1,128], index: 6, kind: input, shape index: {}]   ;;  %s782_s7 = inlined_call_operand.hbm [shape: f32[8,128], index: 7, kind: output, shape index: {}]  }
   0x1   :  { %13 = vsyncpa [#allocation6], 0 }
   0x2   :  { %14 = vsyncpa [#allocation4], 0  ;;  %s36_s26 = sshll.u32 %s778_s3, 4  ;;  %s702_s27 = smov [#allocation5]   ;;  %s37_s26 = int_to_ptr.hbm [resolvable:$true] %s36_s26 }
   0x3   :  { %s38_s28 = sshll.u32 %s702_s27, 4  ;;  %s21_s8 = sshll.u32 %s776_s1, 4  ;;  %s39_s28 = int_to_ptr.vmem [resolvable:$true] %s38_s28  ;;  %s22_s8 = int_to_ptr.hbm [resolvable:$true] %s21_s8 }
   0x4   :  { %s703_s9 = smov 64   ;;  %s704_s10 = smov 4  }
   0x5   :  { %44 = dma.hbm_to_vmem [thread:$0]  %s37_s26, 2048, %s39_s28, [#allocation6], %s703_s9, %s703_s9, %s704_s10  }
   0x6   :  { %s705_s11 = smov [#allocation2]   ;;  %s51_s15 = sshll.u32 %s780_s5, 4  ;;  %s52_s15 = int_to_ptr.hbm [resolvable:$true] %s51_s15 }
   0x7   :  { %s23_s12 = sshll.u32 %s705_s11, 4  ;;  %s706_s3 = smov [#allocation7]   ;;  %s24_s12 = int_to_ptr.vmem [resolvable:$true] %s23_s12 }
   0x8   :  { %29 = dma.hbm_to_vmem [thread:$0]  %s22_s8, 1024, %s24_s12, [#allocation3], %s703_s9, %s703_s9, %s704_s10  }
   0x9   :  { %s53_s16 = sshll.u32 %s706_s3, 4  ;;  %s54_s16 = int_to_ptr.vmem [resolvable:$true] %s53_s16 }
   0xa   :  { %59 = dma.hbm_to_vmem [thread:$0]  %s52_s15, 1024, %s54_s16, [#allocation6], %s703_s9, %s703_s9, %s704_s10  }
   0xb   :  { %696 = dma.done.wait [#allocation3], 1024  }
   0xc   :  { %697 = vsyncadd [#allocation3], 4294966272 }
   0xd   :  { %698 = dma.done.wait [#allocation6], 3072  }
   0xe   :  { %699 = vsyncadd [#allocation6], 4294964224  ;;  %v565_v0 = vld [vmem:[#allocation2 + $0x38] sm:$0xff]  ;;  %v564_v1 = vld [vmem:[#allocation2 + $0x30] sm:$0xff]  ;;  %s707_s23 = smov [#allocation8]   ;;  %s418_s27 = sshll.u32 %s782_s7, 4  ;;  %s419_s27 = int_to_ptr.hbm [resolvable:$true] %s418_s27 }
   0xf   :  { %144 = vmatpush.bf16.msra.mxu0 %v565_v0  ;;  %v573_v2 = vld [vmem:[#allocation5 + $0x38] sm:$0xff]  ;;  %v572_v3 = vld [vmem:[#allocation5 + $0x30] sm:$0xff]  ;;  %v563_v4 = vld [vmem:[#allocation2 + $0x28] sm:$0xff]  ;;  %s416_s24 = sshll.u32 %s707_s23, 4  ;;  %s417_s24 = int_to_ptr.vmem [resolvable:$true] %s416_s24 }
  0x10   :  { %227 = vmatpush.bf16.msra.mxu1 %v573_v2  ;;  %v571_v5 = vld [vmem:[#allocation5 + $0x28] sm:$0xff]  ;;  %v562_v6 = vld [vmem:[#allocation2 + $0x20] sm:$0xff]  ;;  %v561_v8 = vld [vmem:[#allocation2 + $0x18] sm:$0xff] }
  0x11   :  { %v570_v7 = vld [vmem:[#allocation5 + $0x20] sm:$0xff]  ;;  %v569_v9 = vld [vmem:[#allocation5 + $0x18] sm:$0xff]  ;;  %v560_v10 = vld [vmem:[#allocation2 + $0x10] sm:$0xff] }
  0x12   :  { %v568_v11 = vld [vmem:[#allocation5 + $0x10] sm:$0xff]  ;;  %v559_v12 = vld [vmem:[#allocation2 + $0x8] sm:$0xff]  ;;  %v558_v13 = vld [vmem:[#allocation2] sm:$0xff] }
  0x13   :  { %145 = vmatpush.bf16.msra.mxu0 %v564_v1  ;;  %v74_v14 = vld [vmem:[%s775_s0] sm:$0xff]  ;;  %v567_v16 = vld [vmem:[#allocation5 + $0x8] sm:$0xff]  ;;  %v581_v18 = vld [vmem:[#allocation5 + $0x78] sm:$0xff] }
  0x14   :  { %228 = vmatpush.bf16.msra.mxu1 %v572_v3  ;;  %v75_v15 = vpack.c.bf16 %v74_v14, %v74_v14  ;;  %v566_v17 = vld [vmem:[#allocation5] sm:$0xff]  ;;  %313 = vmatpush.bf16.msra.mxu2 %v581_v18  ;;  %v580_v19 = vld [vmem:[#allocation5 + $0x70] sm:$0xff]  ;;  %v579_v20 = vld [vmem:[#allocation5 + $0x68] sm:$0xff] }
  0x15   :  { %v578_v21 = vld [vmem:[#allocation5 + $0x60] sm:$0xff]  ;;  %v577_v22 = vld [vmem:[#allocation5 + $0x58] sm:$0xff]  ;;  %v576_v23 = vld [vmem:[#allocation5 + $0x50] sm:$0xff] }
  0x16   :  { %v596_v24 = vld [vmem:[%s777_s2] ss:$0 sm:$0xff]  ;;  %v575_v30 = vld [vmem:[#allocation5 + $0x48] sm:$0xff]  ;;  %v589_v32 = vld [vmem:[#allocation7 + $0x38] sm:$0xff] }
  0x17   :  { %146 = vmatpush.bf16.msra.mxu0 %v563_v4  ;;  %v574_v31 = vld [vmem:[#allocation5 + $0x40] sm:$0xff]  ;;  %397 = vmatpush.bf16.msra.mxu3 %v589_v32  ;;  %v588_v33 = vld [vmem:[#allocation7 + $0x30] sm:$0xff]  ;;  %v587_v34 = vld [vmem:[#allocation7 + $0x28] sm:$0xff] }
  0x18   :  { %229 = vmatpush.bf16.msra.mxu1 %v571_v5  ;;  %314 = vmatpush.bf16.msra.mxu2 %v580_v19  ;;  %v586_v35 = vld [vmem:[#allocation7 + $0x20] sm:$0xff]  ;;  %v585_v36 = vld [vmem:[#allocation7 + $0x18] sm:$0xff]  ;;  %v584_v37 = vld [vmem:[#allocation7 + $0x10] sm:$0xff] }
  0x19   :  { %v597_v38 = vld [vmem:[%s779_s4] ss:$0 sm:$0xff]  ;;  %v583_v45 = vld [vmem:[#allocation7 + $0x8] sm:$0xff]  ;;  %v598_v47 = vld [vmem:[%s779_s4 + $0x1] ss:$0 sm:$0xff] }
  0x1a   :  { %v582_v46 = vld [vmem:[#allocation7] sm:$0xff] }
  0x1b   :  { %147 = vmatpush.bf16.msra.mxu0 %v562_v6  ;;  %398 = vmatpush.bf16.msra.mxu3 %v588_v33  ;;  %v599_v54 = vld [vmem:[%s781_s6] ss:$0 sm:$0xff] }
  0x1c   :  { %230 = vmatpush.bf16.msra.mxu1 %v570_v7  ;;  %315 = vmatpush.bf16.msra.mxu2 %v579_v20 }
  0x1f   :  { %148 = vmatpush.bf16.msra.mxu0 %v561_v8  ;;  %399 = vmatpush.bf16.msra.mxu3 %v587_v34 }
  0x20   :  { %231 = vmatpush.bf16.msra.mxu1 %v569_v9  ;;  %316 = vmatpush.bf16.msra.mxu2 %v578_v21 }
  0x23   :  { %149 = vmatpush.bf16.msra.mxu0 %v560_v10  ;;  %400 = vmatpush.bf16.msra.mxu3 %v586_v35 }
  0x24   :  { %232 = vmatpush.bf16.msra.mxu1 %v568_v11  ;;  %317 = vmatpush.bf16.msra.mxu2 %v577_v22 }
  0x27   :  { %150 = vmatpush.bf16.msra.mxu0 %v559_v12  ;;  %401 = vmatpush.bf16.msra.mxu3 %v585_v36 }
  0x28   :  { %233 = vmatpush.bf16.msra.mxu1 %v567_v16  ;;  %318 = vmatpush.bf16.msra.mxu2 %v576_v23 }
  0x2b   :  { %151 = vmatpush.bf16.msra.mxu0 %v558_v13  ;;  %402 = vmatpush.bf16.msra.mxu3 %v584_v37 }
  0x2c   :  { %234 = vmatpush.bf16.msra.mxu1 %v566_v17  ;;  %319 = vmatpush.bf16.msra.mxu2 %v575_v30 }
  0x2e   :  { %152 = vmatmul.bf16.vlgmr.msra.gmra.mxu0 %v75_v15 }
  0x2f   :  { %403 = vmatpush.bf16.msra.mxu3 %v583_v45 }
  0x30   :  { %320 = vmatpush.bf16.msra.mxu2 %v574_v31 }
  0x33   :  { %404 = vmatpush.bf16.msra.mxu3 %v582_v46 }
  0xab   :  { %v153_v25 = vpop.f32.mrf.mxu0 }
  0xac   :  { %v154_v26 = vadd.f32 %v596_v24, %v153_v25 }
  0xae   :  { %v157_v27 = vmax.f32 %v154_v26, 0.0 }
  0xb0   :  { %v158_v28 = vpack.c.bf16 %v157_v27, %v157_v27 }
  0xb2   :  { %235 = vmatmul.bf16.vlgmr.msra.gmra.mxu1 %v158_v28 }
  0xb3   :  { %v155_v29 = vpop.f32.mrf.mxu0 }
 0x12f   :  { %v236_v39 = vpop.f32.mrf.mxu1 }
 0x130   :  { %v237_v40 = vadd.f32 %v597_v38, %v236_v39 }
 0x132   :  { %v240_v41 = vmax.f32 %v237_v40, 0.0 }
 0x134   :  { %v241_v42 = vadd.f32 %v240_v41, %v157_v27 }
 0x136   :  { %v242_v43 = vpack.c.bf16 %v241_v42, %v241_v42 }
 0x137   :  { %v238_v44 = vpop.f32.mrf.mxu1 }
 0x138   :  { %321 = vmatmul.bf16.vlgmr.msra.gmra.mxu2 %v242_v43 }
 0x1bb   :  { %v322_v48 = vpop.f32.mrf.mxu2 }
 0x1bc   :  { %v323_v49 = vadd.f32 %v598_v47, %v322_v48 }
 0x1be   :  { %v326_v50 = vmax.f32 %v323_v49, 0.0 }
 0x1c0   :  { %v327_v51 = vadd.f32 %v326_v50, %v240_v41 }
 0x1c2   :  { %v328_v52 = vpack.c.bf16 %v327_v51, %v327_v51 }
 0x1c3   :  { %v324_v53 = vpop.f32.mrf.mxu2 }
 0x1c4   :  { %405 = vmatmul.bf16.vlgmr.msra.gmra.mxu3 %v328_v52 }
 0x247   :  { %v406_v55 = vpop.f32.mrf.mxu3 }
 0x248   :  { %v407_v56 = vadd.f32 %v599_v54, %v406_v55 }
 0x24a   :  { %410 = vst [vmem:[#allocation8] sm:$0xff] %v407_v56 }
 0x24b   :  { %421 = dma.vmem_to_hbm [thread:$0]  %s417_s24, 128, %s419_s27, [#allocation4]  }
 0x24f   :  { %v408_v57 = vpop.f32.mrf.mxu3 }
 0x250   :  { %700 = dma.done.wait [#allocation4], 128  }
 0x251   :  { %701 = vsyncadd [#allocation4], 4294967168 }
 0x252   :  { %426 = vsyncpa [#allocation3], 1 }
 0x253   :  { %427 = vsyncpa [#allocation6], 1 }
 0x254   :  { %428 = vsyncpa [#allocation4], 1 }

</bundles_post_ra>
